<compile_context>
chip_gen: v6e
topology: v6e:2x2x1
jax: 0.10.0
libtpu: 0.0.40
codegen_flags: <defaults>
</compile_context>

<pallas_src>
import jax
import jax.numpy as jnp
from jax.experimental import pallas as pl
from jax.experimental.pallas import tpu as pltpu

LANE_COLS = 512                          # lanes per row (multiple of 128)
ROW_GRANULE = 8                          # sublane granule
PAD_GRANULE = ROW_GRANULE * LANE_COLS    # pad N to a multiple of 4096 points


def _round_up(x, m):
    return ((x + m - 1) // m) * m


def _pick_block_rows(num_rows):
    """Rows (of LANE_COLS points each) per grid step, per TPU generation."""
    kind = ""
    try:
        kind = jax.devices()[0].device_kind.lower()
    except Exception:
        pass
    if "v7" in kind:
        # Two TensorCores share HBM: cap blocks at 64K points (2 MiB
        # double-buffered) and split the grid in >=2 so both cores get work.
        cap_rows = (64 * 1024) // LANE_COLS          # 128 rows
        target = _round_up(max(1, (num_rows + 1) // 2), ROW_GRANULE)
    else:
        # v5e / v6e: single TensorCore; 256K-point blocks (8 MiB double-
        # buffered, under v5e's 16 MiB default scoped VMEM) amortize the
        # ~0.35 us per-grid-step overhead to <5%.
        cap_rows = (256 * 1024) // LANE_COLS         # 512 rows
        target = num_rows
    return max(ROW_GRANULE, min(cap_rows, target, num_rows))


def _sphere_sdf_kernel(params_ref, pts_ref, out_ref):
    # params_ref: SMEM (4,) f32 = [cx, cy, cz, radius]   (scalar prefetch)
    # pts_ref:    VMEM (3, TR, C) f32  (planar: plane 0/1/2 = x/y/z)
    # out_ref:    VMEM (TR, C) f32
    cx = params_ref[0]
    cy = params_ref[1]
    cz = params_ref[2]
    r = params_ref[3]

    d0 = pts_ref[0] - cx            # (TR, C) dense vregs, VPU only
    d1 = pts_ref[1] - cy
    d2 = pts_ref[2] - cz
    # sqrt goes to the EUP (separate issue slot); everything stays f32.
    out_ref[...] = jnp.sqrt(d0 * d0 + d1 * d1 + d2 * d2) - r


def _pack_params(center, radius):
    return jnp.concatenate([
        jnp.asarray(center, jnp.float32).reshape(-1)[:3],
        jnp.asarray(radius, jnp.float32).reshape(1),
    ])


def _sphere_sdf_planar_call(planar, params):
    # planar: (3, R, C) f32 with R % 8 == 0 and C % 128 == 0.
    _, num_rows, cols = planar.shape
    tr = _pick_block_rows(num_rows)
    grid = pl.cdiv(num_rows, tr)
    return pl.pallas_call(
        _sphere_sdf_kernel,
        out_shape=jax.ShapeDtypeStruct((num_rows, cols), jnp.float32),
        grid_spec=pltpu.PrefetchScalarGridSpec(
            num_scalar_prefetch=1,
            grid=(grid,),
            # index_maps receive the scalar-prefetch ref as a trailing arg.
            # (pipeline_mode=pl.Buffered(3) is available on the input spec if
            #  profiling ever shows exposed DMA at the small v7x blocks; the
            #  default depth-2 pipeline hides DMA at these block sizes.)
            in_specs=[pl.BlockSpec((3, tr, cols), lambda i, prm: (0, i, 0))],
            out_specs=pl.BlockSpec((tr, cols), lambda i, prm: (i, 0)),
        ),
        compiler_params=pltpu.CompilerParams(
            dimension_semantics=("parallel",),
        ),
    )(params, planar)


def sphere_sdf_planar(points_planar, center, radius):
    """Fast path: planar/SoA input of shape (3, ...). No transpose HBM pass.

    Returns the SDF as (N, 1), N = number of points.
    """
    p = jnp.asarray(points_planar, jnp.float32).reshape(3, -1)
    n = p.shape[1]
    n_pad = _round_up(max(n, 1), PAD_GRANULE)
    if n_pad != n:
        p = jnp.pad(p, ((0, 0), (0, n_pad - n)))
    planar = p.reshape(3, n_pad // LANE_COLS, LANE_COLS)
    out = _sphere_sdf_planar_call(planar, _pack_params(center, radius)).reshape(-1)
    if n_pad != n:
        out = out[:n]
    return out.reshape(n, 1)


def sphere_sdf(points, center, radius):
    """Module-faithful path: points of shape (..., 3) (AoS, like the nn.Module).

    NOTE: AoS input forces one layout-change copy (pad + transpose, fused by
    XLA into a single ~24 B/point pass) before the kernel's 16 B/point
    streaming pass.  That copy -- not the kernel -- dominates end-to-end time;
    use sphere_sdf_planar() when the producer can emit (3, N) directly.
    """
    pts = jnp.asarray(points, jnp.float32).reshape(-1, 3)
    n = pts.shape[0]
    n_pad = _round_up(max(n, 1), PAD_GRANULE)
    if n_pad != n:
        pts = jnp.pad(pts, ((0, n_pad - n), (0, 0)))
    planar = pts.T.reshape(3, n_pad // LANE_COLS, LANE_COLS)
    out = _sphere_sdf_planar_call(planar, _pack_params(center, radius)).reshape(-1)
    if n_pad != n:
        out = out[:n]
    return out.reshape(n, 1)


if __name__ == "__main__":
    key = jax.random.PRNGKey(0)

    # Deterministic "cfg" parameters (synthetic init, no checkpoint load).
    radius = jnp.float32(1.0)                                  # cfg.radius.val
    center = jnp.array([[0.1, 0.2, 0.3]], dtype=jnp.float32)   # cfg.center.val (unsqueezed)

    # Example input: a batch of 3-D points, shape (2, 16, 16, 3) -> N = 512 rows.
    points = jax.random.normal(key, (2, 16, 16, 3), dtype=jnp.float32)

    out = sphere_sdf(points, center, radius)
    out = jax.block_until_ready(out)

    # Pure-JAX reference check.
    pts_flat = points.reshape(-1, 3)
    ref = jnp.linalg.norm(pts_flat - center, axis=-1, keepdims=True) - radius
    assert out.shape == ref.shape == (pts_flat.shape[0], 1)
    assert jnp.allclose(out, ref, atol=1e-5, rtol=1e-5)

    # Planar (transpose-free) fast path gives identical numerics.
    out_planar = jax.block_until_ready(sphere_sdf_planar(pts_flat.T, center, radius))
    assert jnp.allclose(out_planar, ref, atol=1e-5, rtol=1e-5)

    print("KERNEL_OK")
</pallas_src>

<mosaic_0001>
module attributes {stable_mosaic.version = 11 : i64} {
  func.func @_sphere_sdf_kernel(%arg0: i32, %arg1: memref<4xf32, #tpu.memory_space<smem>>, %arg2: memref<3x8x512xf32, #tpu.memory_space<vmem>>, %arg3: memref<8x512xf32, #tpu.memory_space<vmem>>) attributes {dimension_semantics = [#tpu.dimension_semantics<parallel>], iteration_bounds = array<i64: 1>, scalar_prefetch = 1 : i64, scratch_operands = 0 : i64, tpu.core_type = #tpu.core_type<tc>, window_params = [{transform_indices = @transform_0, window_bounds = array<i64: 3, 8, 512>}, {transform_indices = @transform_1, window_bounds = array<i64: 8, 512>}]} {
    %c0 = arith.constant 0 : index
    %0 = memref.load %arg1[%c0] : memref<4xf32, #tpu.memory_space<smem>>
    %c1 = arith.constant 1 : index
    %1 = memref.load %arg1[%c1] : memref<4xf32, #tpu.memory_space<smem>>
    %c2 = arith.constant 2 : index
    %2 = memref.load %arg1[%c2] : memref<4xf32, #tpu.memory_space<smem>>
    %c3 = arith.constant 3 : index
    %3 = memref.load %arg1[%c3] : memref<4xf32, #tpu.memory_space<smem>>
    %c0_0 = arith.constant 0 : index
    %c0_1 = arith.constant 0 : index
    %c0_2 = arith.constant 0 : index
    %4 = vector.load %arg2[%c0_0, %c0_1, %c0_2] : memref<3x8x512xf32, #tpu.memory_space<vmem>>, vector<1x8x512xf32>
    %5 = vector.shape_cast %4 : vector<1x8x512xf32> to vector<8x512xf32>
    %6 = vector.broadcast %0 : f32 to vector<8x512xf32>
    %7 = arith.subf %5, %6 : vector<8x512xf32>
    %c1_3 = arith.constant 1 : index
    %c0_4 = arith.constant 0 : index
    %c0_5 = arith.constant 0 : index
    %8 = vector.load %arg2[%c1_3, %c0_4, %c0_5] : memref<3x8x512xf32, #tpu.memory_space<vmem>>, vector<1x8x512xf32>
    %9 = vector.shape_cast %8 : vector<1x8x512xf32> to vector<8x512xf32>
    %10 = vector.broadcast %1 : f32 to vector<8x512xf32>
    %11 = arith.subf %9, %10 : vector<8x512xf32>
    %c2_6 = arith.constant 2 : index
    %c0_7 = arith.constant 0 : index
    %c0_8 = arith.constant 0 : index
    %12 = vector.load %arg2[%c2_6, %c0_7, %c0_8] : memref<3x8x512xf32, #tpu.memory_space<vmem>>, vector<1x8x512xf32>
    %13 = vector.shape_cast %12 : vector<1x8x512xf32> to vector<8x512xf32>
    %14 = vector.broadcast %2 : f32 to vector<8x512xf32>
    %15 = arith.subf %13, %14 : vector<8x512xf32>
    %16 = arith.mulf %7, %7 : vector<8x512xf32>
    %17 = arith.mulf %11, %11 : vector<8x512xf32>
    %18 = arith.addf %16, %17 : vector<8x512xf32>
    %19 = arith.mulf %15, %15 : vector<8x512xf32>
    %20 = arith.addf %18, %19 : vector<8x512xf32>
    %21 = math.sqrt %20 : vector<8x512xf32>
    %22 = vector.broadcast %3 : f32 to vector<8x512xf32>
    %23 = arith.subf %21, %22 : vector<8x512xf32>
    %c0_9 = arith.constant 0 : index
    %c0_10 = arith.constant 0 : index
    %24 = vector.load %arg3[%c0_9, %c0_10] : memref<8x512xf32, #tpu.memory_space<vmem>>, vector<8x512xf32>
    tpu.vector_store %arg3[%c0_9, %c0_10], %23 {strides = array<i32>} : memref<8x512xf32, #tpu.memory_space<vmem>>, vector<8x512xf32>,
    return
  }
  func.func @transform_0(%arg0: i32, %arg1: memref<4xf32, #tpu.memory_space<smem>>) -> (i32, i32, i32) {
    %c0_i32 = arith.constant 0 : i32
    %c0_i32_0 = arith.constant 0 : i32
    %c0_i32_1 = arith.constant 0 : i32
    return %c0_i32, %arg0, %c0_i32_0 : i32, i32, i32
  }
  func.func @transform_1(%arg0: i32, %arg1: memref<4xf32, #tpu.memory_space<smem>>) -> (i32, i32) {
    %c0_i32 = arith.constant 0 : i32
    %c0_i32_0 = arith.constant 0 : i32
    return %arg0, %c0_i32 : i32, i32
  }
}

</mosaic_0001>

<bundles_post_ra>
// kernel: tpu_custom_call.1
= control target key start
LH: loop header
LB: loop body
LE: loop exit
PB: predicated region body
PF: predicated region fallthrough
CT: control target
= control target key end

     0   :  { %s203_s9 = smov [#allocation3]   ;;  %s232_s0 = inlined_call_operand.hbm [shape: f32[4], index: 0, kind: input, shape index: {}]   ;;  %s233_s1 = inlined_call_operand.hbm [shape: f32[3,8,512], index: 1, kind: input, shape index: {}]   ;;  %s234_s2 = inlined_call_operand.hbm [shape: f32[8,512], index: 2, kind: output, shape index: {}]  }
   0x1   :  { %8 = dma.hbm_to_smem %s232_s0, 16, %s203_s9, [#allocation2] }
   0x2   :  { %197 = dma.done.wait [#allocation2], 16 }
   0x3   :  { %198 = vsyncadd [#allocation2], 4294967280 }
   0x4   :  { %10 = sfence }
   0x5   :  { %11 = vsyncpa [#allocation5], 0 }
   0x6   :  { %12 = vsyncpa [#allocation6], 0  ;;  %s204_s12 = smov [#allocation4]  }
   0x7   :  { %s18_s13 = sshll.u32 %s204_s12, 4  ;;  %s19_s13 = int_to_ptr.vmem [resolvable:$true] %s18_s13 }
   0x8   :  { %s165_s14 = scalar_lea.vmem %s19_s13, 1536  ;;  %p170_p1 = scmp.lt.s32.totalorder %s19_s13, %s19_s13 }
   0x9   :  { %p166_p0 = scmp.ne.s32.totalorder %s19_s13, %s165_s14  ;;  %p171_p2 = scmp.lt.s32.totalorder %s165_s14, %s165_s14 }
   0xb   :  { %p172_p3 = por %p171_p2, %p170_p1 }
   0xd   :  { %p173_p4 = pnand %p172_p3, %p166_p0 }
   0xf   :  { %176 = shalt.err (!%p173_p4)
}
  0x10   :  { %s205_s15 = smov 512   ;;  %s206_s16 = smov 32  }
  0x11   :  { %24 = dma.hbm_to_vmem [thread:$0]  %s233_s1, 1536, %s19_s13, [#allocation5], %s205_s15, %s205_s15, %s206_s16  }
  0x12   :  { %199 = dma.done.wait [#allocation5], 1536  }
  0x13   :  { %200 = vsyncadd [#allocation5], 4294965760  ;;  %s28_s0 = sld [smem:[#allocation3]]  ;;  %v32_v0 = vld [vmem:[#allocation4] sm:$0xff]  ;;  %v33_v6 = vld [vmem:[#allocation4 + $0x8] sm:$0xff]  ;;  %s207_s21 = smov [#allocation7]  }
  0x14   :  { %s133_s19 = sld [smem:[#allocation3 + $0x1]]  ;;  %v42_v2 = vld [vmem:[#allocation4 + $0x20] sm:$0xff]  ;;  %v43_v7 = vld [vmem:[#allocation4 + $0x28] sm:$0xff]  ;;  %v34_v13 = vld [vmem:[#allocation4 + $0x10] sm:$0xff]  ;;  %s124_s22 = sshll.u32 %s207_s21, 4  ;;  %s125_s22 = int_to_ptr.vmem [resolvable:$true] %s124_s22 }
  0x15   :  { %s134_s20 = sld [smem:[#allocation3 + $0x2]]  ;;  %v52_v3 = vld [vmem:[#allocation4 + $0x40] sm:$0xff]  ;;  %v53_v8 = vld [vmem:[#allocation4 + $0x48] sm:$0xff]  ;;  %v44_v14 = vld [vmem:[#allocation4 + $0x30] sm:$0xff]  ;;  %s177_s23 = scalar_lea.vmem %s125_s22, 512 }
  0x16   :  { %v54_v15 = vld [vmem:[#allocation4 + $0x50] sm:$0xff]  ;;  %v35_v19 = vld [vmem:[#allocation4 + $0x18] sm:$0xff]  ;;  %s135_s1 = sld [smem:[#allocation3 + $0x3]]  ;;  %p178_p5 = scmp.ne.s32.totalorder %s125_s22, %s177_s23 }
  0x17   :  { %v45_v24 = vld [vmem:[#allocation4 + $0x38] sm:$0xff]  ;;  %p182_p6 = scmp.lt.s32.totalorder %s125_s22, %s125_s22  ;;  %p183_p7 = scmp.lt.s32.totalorder %s177_s23, %s177_s23 }
  0x18   :  { %v55_v25 = vld [vmem:[#allocation4 + $0x58] sm:$0xff] }
  0x19   :  { %v36_v1 = vstv %s28_s0  ;;  %p184_p8 = por %p183_p7, %p182_p6 }
  0x1a   :  { %v37_v4 = vsub.f32 %v32_v0, %v36_v1  ;;  %v46_v5 = vstv %s133_s19  ;;  %v38_v11 = vsub.f32 %v33_v6, %v36_v1  ;;  %v39_v23 = vsub.f32 %v34_v13, %v36_v1 }
  0x1b   :  { %v47_v9 = vsub.f32 %v42_v2, %v46_v5  ;;  %v56_v10 = vstv %s134_s20  ;;  %v48_v12 = vsub.f32 %v43_v7, %v46_v5  ;;  %v49_v28 = vsub.f32 %v44_v14, %v46_v5  ;;  %p185_p9 = pnand %p184_p8, %p178_p5 }
  0x1c   :  { %v57_v16 = vsub.f32 %v52_v3, %v56_v10  ;;  %v61_v17 = vmul.f32 %v37_v4, %v37_v4  ;;  %v58_v18 = vsub.f32 %v53_v8, %v56_v10  ;;  %v62_v21 = vmul.f32 %v38_v11, %v38_v11 }
  0x1d   :  { %v65_v20 = vmul.f32 %v47_v9, %v47_v9  ;;  %v66_v22 = vmul.f32 %v48_v12, %v48_v12  ;;  %v59_v29 = vsub.f32 %v54_v15, %v56_v10  ;;  %v63_v32 = vmul.f32 %v39_v23, %v39_v23 }
  0x1e   :  { %v73_v26 = vmul.f32 %v57_v16, %v57_v16  ;;  %v74_v27 = vmul.f32 %v58_v18, %v58_v18  ;;  %v40_v33 = vsub.f32 %v35_v19, %v36_v1  ;;  %v67_v34 = vmul.f32 %v49_v28, %v49_v28 }
  0x1f   :  { %v69_v30 = vadd.f32 %v65_v20, %v61_v17  ;;  %v70_v31 = vadd.f32 %v66_v22, %v62_v21  ;;  %v50_v35 = vsub.f32 %v45_v24, %v46_v5  ;;  %v60_v36 = vsub.f32 %v55_v25, %v56_v10 }
  0x20   :  { %v75_v39 = vmul.f32 %v59_v29, %v59_v29  ;;  %v64_v40 = vmul.f32 %v40_v33, %v40_v33  ;;  %v71_v41 = vadd.f32 %v67_v34, %v63_v32  ;;  %v109_v52 = vstv %s135_s1 }
  0x21   :  { %v77_v37 = vadd.f32 %v73_v26, %v69_v30  ;;  %v78_v38 = vadd.f32 %v74_v27, %v70_v31  ;;  %v68_v42 = vmul.f32 %v50_v35, %v50_v35  ;;  %v76_v43 = vmul.f32 %v60_v36, %v60_v36 }
  0x22   :  { %v79_v44 = vadd.f32 %v75_v39, %v71_v41 }
  0x23   :  { %141 = vrsqrt.f32 %v77_v37  ;;  %v72_v45 = vadd.f32 %v68_v42, %v64_v40  ;;  %vm83_vm0 = vcmp.eq.f32.partialorder %v77_v37, inf  ;;  %v86_v48 = vand.u32 2147483648, %v77_v37 }
  0x24   :  { %143 = vrsqrt.f32 %v78_v38  ;;  %vm85_vm1 = vcmp.eq.f32.partialorder %v77_v37, 0.0  ;;  %vm90_vm2 = vcmp.eq.f32.partialorder %v78_v38, inf  ;;  %v93_v51 = vand.u32 2147483648, %v78_v38 }
  0x25   :  { %145 = vrsqrt.f32 %v79_v44  ;;  %v80_v46 = vadd.f32 %v76_v43, %v72_v45  ;;  %vm92_vm3 = vcmp.eq.f32.partialorder %v78_v38, 0.0  ;;  %vm97_vm4 = vcmp.eq.f32.partialorder %v79_v44, inf }
  0x26   :  { %v100_v58 = vand.u32 2147483648, %v79_v44  ;;  %vm99_vm5 = vcmp.eq.f32.partialorder %v79_v44, 0.0 }
  0x27   :  { %147 = vrsqrt.f32 %v80_v46  ;;  %vm104_vm6 = vcmp.eq.f32.partialorder %v80_v46, inf  ;;  %v107_v1 = vand.u32 2147483648, %v80_v46  ;;  %vm106_vm7 = vcmp.eq.f32.partialorder %v80_v46, 0.0 }
  0x30   :  { %v142_v47 = vpop.eup %141 }
  0x31   :  { %v144_v49 = vpop.eup %143  ;;  %v82_v50 = vmul.f32 %v142_v47, %v77_v37 }
  0x32   :  { %v89_v53 = vmul.f32 %v144_v49, %v78_v38  ;;  %v146_v55 = vpop.eup %145 }
  0x33   :  { %v84_v54 = vsel %vm83_vm0, %v77_v37, %v82_v50  ;;  %v96_v61 = vmul.f32 %v146_v55, %v79_v44 }
  0x34   :  { %v87_v56 = vsel %vm85_vm1, %v86_v48, %v84_v54  ;;  %v91_v57 = vsel %vm90_vm2, %v78_v38, %v89_v53  ;;  %v148_v63 = vpop.eup %147 }
  0x35   :  { %v110_v59 = vsub.f32 %v87_v56, %v109_v52  ;;  %v94_v60 = vsel %vm92_vm3, %v93_v51, %v91_v57  ;;  %v98_v0 = vsel %vm97_vm4, %v79_v44, %v96_v61  ;;  %v103_v3 = vmul.f32 %v148_v63, %v80_v46 }
  0x36   :  { %v111_v62 = vsub.f32 %v94_v60, %v109_v52  ;;  %v101_v2 = vsel %vm99_vm5, %v100_v58, %v98_v0 }
  0x37   :  { %114 = vst [vmem:[#allocation7] sm:$0xff] %v110_v59  ;;  %v112_v4 = vsub.f32 %v101_v2, %v109_v52  ;;  %v105_v5 = vsel %vm104_vm6, %v80_v46, %v103_v3 }
  0x38   :  { %115 = vst [vmem:[#allocation7 + $0x8] sm:$0xff] %v111_v62  ;;  %v108_v6 = vsel %vm106_vm7, %v107_v1, %v105_v5 }
  0x39   :  { %116 = vst [vmem:[#allocation7 + $0x10] sm:$0xff] %v112_v4  ;;  %v113_v7 = vsub.f32 %v108_v6, %v109_v52 }
  0x3b   :  { %117 = vst [vmem:[#allocation7 + $0x18] sm:$0xff] %v113_v7 }
  0x3c   :  { %188 = shalt.err (!%p185_p9)
}
  0x3d   :  { %127 = dma.vmem_to_hbm [thread:$0]  %s125_s22, 512, %s234_s2, [#allocation6]  }
  0x3e   :  { %201 = dma.done.wait [#allocation6], 512  }
  0x3f   :  { %202 = vsyncadd [#allocation6], 4294966784 }
  0x40   :  { %131 = vsyncpa [#allocation5], 1 }
  0x41   :  { %132 = vsyncpa [#allocation6], 1 }

</bundles_post_ra>
